<compile_context>
chip_gen: v5e
topology: v5e:2x2
jax: 0.10.0
libtpu: 0.0.40
codegen_flags: <defaults>
</compile_context>

<pallas_src>
import jax
import jax.numpy as jnp
from jax import lax
from jax.experimental import pallas as pl
from jax.experimental.pallas import tpu as pltpu


# ----------------------------- configuration --------------------------------
SEQ = 8        # sequence length
BATCH = 2      # batch size
X_DIM = 16     # x_dim
DENSE_X = 32   # dense_x = [32]
DIM_RNN = 32   # dim_rnn
DENSE_HX = 32  # dense_h_x = [32]
# activation='tanh', type_rnn='RNN', num_rnn=1, dropout -> identity (eval)

# ----------------------- packed-parameter layout ------------------------------
# One contiguous (P_ROWS, PW) f32 buffer.  All row offsets are multiples of 8
# (sublane-tile aligned static slices).  wout/bout are zero-padded to PW lanes.
PW = 32                 # packed lane width (max of all weight output dims)
R_WFE = 0               # (X_DIM, DENSE_X)     rows   0..15
R_BFE = 16              # (1, DENSE_X)         row   16
R_WIH = 24              # (DENSE_X, DIM_RNN)   rows  24..55
R_BRNN = 56             # (1, DIM_RNN)  = bih + bhh, row 56
R_WHH = 64              # (DIM_RNN, DIM_RNN)   rows  64..95
R_WHX = 96              # (DIM_RNN, DENSE_HX)  rows  96..127
R_BHX = 128             # (1, DENSE_HX)        row  128
R_WOUT = 136            # (DENSE_HX, PW)       rows 136..167 (cols X_DIM.. = 0)
R_BOUT = 168            # (1, PW)              row  168      (cols X_DIM.. = 0)
P_ROWS = 176


# ------------------------------- kernel --------------------------------------
def base_rnn_kernel(x_ref,        # (SEQ*BATCH, X_DIM)   all timesteps
                    p_ref,        # (P_ROWS, PW)         packed weights/biases
                    y_ref):       # (SEQ*BATCH, X_DIM)   all timesteps
    # ---- static, tile-aligned slices out of the packed parameter buffer ----
    wfe = p_ref[R_WFE:R_WFE + X_DIM, :]          # (X_DIM, DENSE_X)
    bfe = p_ref[R_BFE:R_BFE + 1, :]              # (1, DENSE_X)
    wih = p_ref[R_WIH:R_WIH + DENSE_X, :]        # (DENSE_X, DIM_RNN)
    brnn = p_ref[R_BRNN:R_BRNN + 1, :]           # (1, DIM_RNN)   (= bih + bhh)
    whh = p_ref[R_WHH:R_WHH + DIM_RNN, :]        # (DIM_RNN, DIM_RNN)
    whx = p_ref[R_WHX:R_WHX + DIM_RNN, :]        # (DIM_RNN, DENSE_HX)
    bhx = p_ref[R_BHX:R_BHX + 1, :]              # (1, DENSE_HX)
    wout = p_ref[R_WOUT:R_WOUT + DENSE_HX, :]    # (DENSE_HX, PW)  zero-padded
    bout = p_ref[R_BOUT:R_BOUT + 1, :]           # (1, PW)         zero-padded

    # ---- batched, non-recurrent prologue (all timesteps at once) ----
    x_all = x_ref[...]                                               # (S*B, X_DIM)
    feat = jnp.tanh(
        jnp.dot(x_all, wfe, preferred_element_type=jnp.float32) + bfe)
    z = jnp.dot(feat, wih, preferred_element_type=jnp.float32) + brnn  # (S*B, DIM_RNN)

    # ---- serial recurrence: h carried in vregs, statically unrolled ----
    h = jnp.zeros((BATCH, DIM_RNN), jnp.float32)
    h_steps = []
    for t in range(SEQ):
        z_t = z[t * BATCH:(t + 1) * BATCH, :]                        # static slice
        h = jnp.tanh(z_t + jnp.dot(h, whh, preferred_element_type=jnp.float32))
        h_steps.append(h)                                            # stays in vregs
    h_all = jnp.concatenate(h_steps, axis=0)                         # (S*B, DIM_RNN)

    # ---- batched epilogue (all timesteps at once) ----
    g = jnp.tanh(
        jnp.dot(h_all, whx, preferred_element_type=jnp.float32) + bhx)
    y_full = jnp.dot(g, wout, preferred_element_type=jnp.float32) + bout  # (S*B, PW)
    y_ref[...] = y_full[:, :X_DIM].astype(y_ref.dtype)               # single writeback


# ------------------------------ wrappers --------------------------------------
def pack_params(params):
    """One-time packing of the 10 parameter arrays into a single f32 buffer.

    Call this once at param-init / jit-const time, NOT per forward call.
    The two RNN biases are pre-summed here (single bias add per step in kernel).
    """
    (wfe, bfe, wih, bih, whh, bhh, whx, bhx, wout, bout) = params
    buf = jnp.zeros((P_ROWS, PW), jnp.float32)
    buf = buf.at[R_WFE:R_WFE + X_DIM, :DENSE_X].set(wfe)
    buf = buf.at[R_BFE, :DENSE_X].set(bfe[0])
    buf = buf.at[R_WIH:R_WIH + DENSE_X, :DIM_RNN].set(wih)
    buf = buf.at[R_BRNN, :DIM_RNN].set((bih + bhh)[0])
    buf = buf.at[R_WHH:R_WHH + DIM_RNN, :DIM_RNN].set(whh)
    buf = buf.at[R_WHX:R_WHX + DIM_RNN, :DENSE_HX].set(whx)
    buf = buf.at[R_BHX, :DENSE_HX].set(bhx[0])
    buf = buf.at[R_WOUT:R_WOUT + DENSE_HX, :X_DIM].set(wout)
    buf = buf.at[R_BOUT, :X_DIM].set(bout[0])
    return buf


def base_rnn_forward(x, packed_params):
    """x: (SEQ, BATCH, X_DIM) f32, packed_params: (P_ROWS, PW) f32 -> y like x."""
    seq, batch, x_dim = x.shape
    x_flat = x.reshape(seq * batch, x_dim)   # row (t*batch + b) == x[t, b, :]

    y_flat = pl.pallas_call(
        base_rnn_kernel,
        out_shape=jax.ShapeDtypeStruct((seq * batch, x_dim), jnp.float32),
        # no grid: whole problem (~25 KiB) lives in VMEM for one invocation
        cost_estimate=pl.CostEstimate(
            flops=131_072, transcendentals=1_600, bytes_accessed=26_624),
    )(x_flat, packed_params)

    return y_flat.reshape(seq, batch, x_dim)


# ---------------------------- pure-JAX reference ------------------------------
def base_rnn_reference(x, params):
    (wfe, bfe, wih, bih, whh, bhh, whx, bhx, wout, bout) = params

    def step(h_prev, x_t):
        feat = jnp.tanh(x_t @ wfe + bfe)
        h_t = jnp.tanh(feat @ wih + bih + h_prev @ whh + bhh)
        g_t = jnp.tanh(h_t @ whx + bhx)
        y_t = g_t @ wout + bout
        return h_t, y_t

    h0 = jnp.zeros((x.shape[1], DIM_RNN), jnp.float32)
    _, y = lax.scan(step, h0, x)
    return y


# --------------------------------- main ---------------------------------------
def init_params(key):
    """Deterministic synthetic parameters (shapes match the PyTorch module)."""
    ks = jax.random.split(key, 10)

    def lin(k, fan_in, fan_out):
        bound = 1.0 / jnp.sqrt(fan_in)
        kw, kb = jax.random.split(k)
        w = jax.random.uniform(kw, (fan_in, fan_out), jnp.float32, -bound, bound)
        b = jax.random.uniform(kb, (1, fan_out), jnp.float32, -bound, bound)
        return w, b

    wfe, bfe = lin(ks[0], X_DIM, DENSE_X)        # feature_extractor_x.linear0
    wih, bih = lin(ks[1], DENSE_X, DIM_RNN)      # rnn.weight_ih_l0 (transposed)
    whh, bhh = lin(ks[2], DIM_RNN, DIM_RNN)      # rnn.weight_hh_l0 (transposed)
    whx, bhx = lin(ks[3], DIM_RNN, DENSE_HX)     # mlp_h_x.linear0
    wout, bout = lin(ks[4], DENSE_HX, X_DIM)     # gen_out
    return (wfe, bfe, wih, bih, whh, bhh, whx, bhx, wout, bout)


if __name__ == "__main__":
    key = jax.random.PRNGKey(0)
    kx, kp = jax.random.split(key)
    x = jax.random.normal(kx, (SEQ, BATCH, X_DIM), jnp.float32)
    params = init_params(kp)

    packed = jax.block_until_ready(pack_params(params))   # one-time, off the hot path

    y = base_rnn_forward(x, packed)
    y = jax.block_until_ready(y)

    y_ref = base_rnn_reference(x, params)
    assert y.shape == (SEQ, BATCH, X_DIM)
    assert jnp.allclose(y, y_ref, atol=1e-5, rtol=1e-5), "mismatch vs JAX reference"

    # TODO(synk): num_rnn > 1 (stacked layers) and type_rnn == 'LSTM' variants
    # would add extra weight/cell-state handling; only the single-layer tanh
    # RNN configuration is implemented here.
    print("KERNEL_OK")
</pallas_src>

<mosaic_0001>
module attributes {stable_mosaic.version = 11 : i64} {
  func.func @base_rnn_kernel(%arg0: memref<16x16xf32, #tpu.memory_space<vmem>>, %arg1: memref<176x32xf32, #tpu.memory_space<vmem>>, %arg2: memref<16x16xf32, #tpu.memory_space<vmem>>) attributes {dimension_semantics = [], scalar_prefetch = 0 : i64, scratch_operands = 0 : i64, tpu.core_type = #tpu.core_type<tc>} {
    %c0 = arith.constant 0 : index
    %c0_0 = arith.constant 0 : index
    %0 = vector.load %arg1[%c0, %c0_0] : memref<176x32xf32, #tpu.memory_space<vmem>>, vector<16x32xf32>
    %c16 = arith.constant 16 : index
    %c0_1 = arith.constant 0 : index
    %1 = vector.load %arg1[%c16, %c0_1] : memref<176x32xf32, #tpu.memory_space<vmem>>, vector<1x32xf32>
    %c24 = arith.constant 24 : index
    %c0_2 = arith.constant 0 : index
    %2 = vector.load %arg1[%c24, %c0_2] : memref<176x32xf32, #tpu.memory_space<vmem>>, vector<32x32xf32>
    %c56 = arith.constant 56 : index
    %c0_3 = arith.constant 0 : index
    %3 = vector.load %arg1[%c56, %c0_3] : memref<176x32xf32, #tpu.memory_space<vmem>>, vector<1x32xf32>
    %c64 = arith.constant 64 : index
    %c0_4 = arith.constant 0 : index
    %4 = vector.load %arg1[%c64, %c0_4] : memref<176x32xf32, #tpu.memory_space<vmem>>, vector<32x32xf32>
    %c96 = arith.constant 96 : index
    %c0_5 = arith.constant 0 : index
    %5 = vector.load %arg1[%c96, %c0_5] : memref<176x32xf32, #tpu.memory_space<vmem>>, vector<32x32xf32>
    %c128 = arith.constant 128 : index
    %c0_6 = arith.constant 0 : index
    %6 = vector.load %arg1[%c128, %c0_6] : memref<176x32xf32, #tpu.memory_space<vmem>>, vector<1x32xf32>
    %c136 = arith.constant 136 : index
    %c0_7 = arith.constant 0 : index
    %7 = vector.load %arg1[%c136, %c0_7] : memref<176x32xf32, #tpu.memory_space<vmem>>, vector<32x32xf32>
    %c168 = arith.constant 168 : index
    %c0_8 = arith.constant 0 : index
    %8 = vector.load %arg1[%c168, %c0_8] : memref<176x32xf32, #tpu.memory_space<vmem>>, vector<1x32xf32>
    %c0_9 = arith.constant 0 : index
    %c0_10 = arith.constant 0 : index
    %9 = vector.load %arg0[%c0_9, %c0_10] : memref<16x16xf32, #tpu.memory_space<vmem>>, vector<16x16xf32>
    %cst = arith.constant dense<0.000000e+00> : vector<16x32xf32>
    %10 = tpu.matmul %9, %0, %cst {dimension_numbers = #tpu.dot_dimension_numbers<[1], [0], [0], [1], [0, 0, 1, 1], [], []>} : vector<16x16xf32>, vector<16x32xf32>, vector<16x32xf32> -> vector<16x32xf32>
    %11 = vector.broadcast %1 : vector<1x32xf32> to vector<16x32xf32>
    %12 = arith.addf %10, %11 : vector<16x32xf32>
    %13 = math.tanh %12 : vector<16x32xf32>
    %cst_11 = arith.constant dense<0.000000e+00> : vector<16x32xf32>
    %14 = tpu.matmul %13, %2, %cst_11 {dimension_numbers = #tpu.dot_dimension_numbers<[1], [0], [0], [1], [0, 0, 1, 1], [], []>} : vector<16x32xf32>, vector<32x32xf32>, vector<16x32xf32> -> vector<16x32xf32>
    %15 = vector.broadcast %3 : vector<1x32xf32> to vector<16x32xf32>
    %16 = arith.addf %14, %15 : vector<16x32xf32>
    %cst_12 = arith.constant 0.000000e+00 : f32
    %17 = vector.broadcast %cst_12 : f32 to vector<2x32xf32>
    %18 = vector.extract_strided_slice %16 {offsets = [0, 0], sizes = [2, 32], strides = [1, 1]} : vector<16x32xf32> to vector<2x32xf32>
    %cst_13 = arith.constant dense<0.000000e+00> : vector<2x32xf32>
    %19 = tpu.matmul %17, %4, %cst_13 {dimension_numbers = #tpu.dot_dimension_numbers<[1], [0], [0], [1], [0, 0, 1, 1], [], []>} : vector<2x32xf32>, vector<32x32xf32>, vector<2x32xf32> -> vector<2x32xf32>
    %20 = arith.addf %18, %19 : vector<2x32xf32>
    %21 = math.tanh %20 : vector<2x32xf32>
    %22 = vector.extract_strided_slice %16 {offsets = [2, 0], sizes = [2, 32], strides = [1, 1]} : vector<16x32xf32> to vector<2x32xf32>
    %cst_14 = arith.constant dense<0.000000e+00> : vector<2x32xf32>
    %23 = tpu.matmul %21, %4, %cst_14 {dimension_numbers = #tpu.dot_dimension_numbers<[1], [0], [0], [1], [0, 0, 1, 1], [], []>} : vector<2x32xf32>, vector<32x32xf32>, vector<2x32xf32> -> vector<2x32xf32>
    %24 = arith.addf %22, %23 : vector<2x32xf32>
    %25 = math.tanh %24 : vector<2x32xf32>
    %26 = vector.extract_strided_slice %16 {offsets = [4, 0], sizes = [2, 32], strides = [1, 1]} : vector<16x32xf32> to vector<2x32xf32>
    %cst_15 = arith.constant dense<0.000000e+00> : vector<2x32xf32>
    %27 = tpu.matmul %25, %4, %cst_15 {dimension_numbers = #tpu.dot_dimension_numbers<[1], [0], [0], [1], [0, 0, 1, 1], [], []>} : vector<2x32xf32>, vector<32x32xf32>, vector<2x32xf32> -> vector<2x32xf32>
    %28 = arith.addf %26, %27 : vector<2x32xf32>
    %29 = math.tanh %28 : vector<2x32xf32>
    %30 = vector.extract_strided_slice %16 {offsets = [6, 0], sizes = [2, 32], strides = [1, 1]} : vector<16x32xf32> to vector<2x32xf32>
    %cst_16 = arith.constant dense<0.000000e+00> : vector<2x32xf32>
    %31 = tpu.matmul %29, %4, %cst_16 {dimension_numbers = #tpu.dot_dimension_numbers<[1], [0], [0], [1], [0, 0, 1, 1], [], []>} : vector<2x32xf32>, vector<32x32xf32>, vector<2x32xf32> -> vector<2x32xf32>
    %32 = arith.addf %30, %31 : vector<2x32xf32>
    %33 = math.tanh %32 : vector<2x32xf32>
    %34 = vector.extract_strided_slice %16 {offsets = [8, 0], sizes = [2, 32], strides = [1, 1]} : vector<16x32xf32> to vector<2x32xf32>
    %cst_17 = arith.constant dense<0.000000e+00> : vector<2x32xf32>
    %35 = tpu.matmul %33, %4, %cst_17 {dimension_numbers = #tpu.dot_dimension_numbers<[1], [0], [0], [1], [0, 0, 1, 1], [], []>} : vector<2x32xf32>, vector<32x32xf32>, vector<2x32xf32> -> vector<2x32xf32>
    %36 = arith.addf %34, %35 : vector<2x32xf32>
    %37 = math.tanh %36 : vector<2x32xf32>
    %38 = vector.extract_strided_slice %16 {offsets = [10, 0], sizes = [2, 32], strides = [1, 1]} : vector<16x32xf32> to vector<2x32xf32>
    %cst_18 = arith.constant dense<0.000000e+00> : vector<2x32xf32>
    %39 = tpu.matmul %37, %4, %cst_18 {dimension_numbers = #tpu.dot_dimension_numbers<[1], [0], [0], [1], [0, 0, 1, 1], [], []>} : vector<2x32xf32>, vector<32x32xf32>, vector<2x32xf32> -> vector<2x32xf32>
    %40 = arith.addf %38, %39 : vector<2x32xf32>
    %41 = math.tanh %40 : vector<2x32xf32>
    %42 = vector.extract_strided_slice %16 {offsets = [12, 0], sizes = [2, 32], strides = [1, 1]} : vector<16x32xf32> to vector<2x32xf32>
    %cst_19 = arith.constant dense<0.000000e+00> : vector<2x32xf32>
    %43 = tpu.matmul %41, %4, %cst_19 {dimension_numbers = #tpu.dot_dimension_numbers<[1], [0], [0], [1], [0, 0, 1, 1], [], []>} : vector<2x32xf32>, vector<32x32xf32>, vector<2x32xf32> -> vector<2x32xf32>
    %44 = arith.addf %42, %43 : vector<2x32xf32>
    %45 = math.tanh %44 : vector<2x32xf32>
    %46 = vector.extract_strided_slice %16 {offsets = [14, 0], sizes = [2, 32], strides = [1, 1]} : vector<16x32xf32> to vector<2x32xf32>
    %cst_20 = arith.constant dense<0.000000e+00> : vector<2x32xf32>
    %47 = tpu.matmul %45, %4, %cst_20 {dimension_numbers = #tpu.dot_dimension_numbers<[1], [0], [0], [1], [0, 0, 1, 1], [], []>} : vector<2x32xf32>, vector<32x32xf32>, vector<2x32xf32> -> vector<2x32xf32>
    %48 = arith.addf %46, %47 : vector<2x32xf32>
    %49 = math.tanh %48 : vector<2x32xf32>
    %50 = tpu.concatenate %21, %25, %29, %33, %37, %41, %45, %49 in 0 : vector<2x32xf32>, vector<2x32xf32>, vector<2x32xf32>, vector<2x32xf32>, vector<2x32xf32>, vector<2x32xf32>, vector<2x32xf32>, vector<2x32xf32> -> vector<16x32xf32>
    %cst_21 = arith.constant dense<0.000000e+00> : vector<16x32xf32>
    %51 = tpu.matmul %50, %5, %cst_21 {dimension_numbers = #tpu.dot_dimension_numbers<[1], [0], [0], [1], [0, 0, 1, 1], [], []>} : vector<16x32xf32>, vector<32x32xf32>, vector<16x32xf32> -> vector<16x32xf32>
    %52 = vector.broadcast %6 : vector<1x32xf32> to vector<16x32xf32>
    %53 = arith.addf %51, %52 : vector<16x32xf32>
    %54 = math.tanh %53 : vector<16x32xf32>
    %cst_22 = arith.constant dense<0.000000e+00> : vector<16x32xf32>
    %55 = tpu.matmul %54, %7, %cst_22 {dimension_numbers = #tpu.dot_dimension_numbers<[1], [0], [0], [1], [0, 0, 1, 1], [], []>} : vector<16x32xf32>, vector<32x32xf32>, vector<16x32xf32> -> vector<16x32xf32>
    %56 = vector.broadcast %8 : vector<1x32xf32> to vector<16x32xf32>
    %57 = arith.addf %55, %56 : vector<16x32xf32>
    %58 = vector.extract_strided_slice %57 {offsets = [0, 0], sizes = [16, 16], strides = [1, 1]} : vector<16x32xf32> to vector<16x16xf32>
    %c0_23 = arith.constant 0 : index
    %c0_24 = arith.constant 0 : index
    %59 = vector.load %arg2[%c0_23, %c0_24] : memref<16x16xf32, #tpu.memory_space<vmem>>, vector<16x16xf32>
    tpu.vector_store %arg2[%c0_23, %c0_24], %58 {strides = array<i32>} : memref<16x16xf32, #tpu.memory_space<vmem>>, vector<16x16xf32>,
    return
  }
}

</mosaic_0001>

<bundles_post_ra>
// kernel: tpu_custom_call.1
= control target key start
LH: loop header
LB: loop body
LE: loop exit
PB: predicated region body
PF: predicated region fallthrough
CT: control target
= control target key end

     0   :  { %vm37_vm0 = vcmask 130048   ;;  %s616_s0 = inlined_call_operand.vmem [shape: f32[16,16], index: 0, kind: input, shape index: {}]   ;;  %s617_s1 = inlined_call_operand.vmem [shape: f32[176,32], index: 1, kind: input, shape index: {}]   ;;  %s618_s2 = inlined_call_operand.hbm [shape: f32[16,16], index: 2, kind: output, shape index: {}]  }
   0x1   :  { %v13_v0 = vld [vmem:[%s617_s1 + $0x8] sm:$0xff]  ;;  %v12_v1 = vld [vmem:[%s617_s1] sm:$0xff] }
   0x2   :  { %429 = vmatpush.msra.mxu3 %v13_v0  ;;  %v35_v2 = vld [vmem:[%s616_s0 + $0x8] sm:$0xff]  ;;  %58 = vmatpush.msra.mxu0 %v13_v0  ;;  %v34_v3 = vld [vmem:[%s616_s0] sm:$0xff] }
   0x4   :  { %430 = vmatpush.msra.mxu3 %v12_v1  ;;  %59 = vmatpush.msra.mxu0 %v12_v1 }
   0x5   :  { %7 = vsyncpa [#allocation3], 0  ;;  %415 = vmatmul.msk.f32.vlgmr.msra.gmra.mxu3 %vm37_vm0, %v35_v2  ;;  %414 = vmatmul.msk.f32.vlgmr.msra.gmra.mxu0 %vm37_vm0, %v34_v3  ;;  %v18_v4 = vld [vmem:[%s617_s1 + $0x30] sm:$0xff]  ;;  %v17_v5 = vld [vmem:[%s617_s1 + $0x28] sm:$0xff]  ;;  %vm70_vm1 = vcmask 261120   ;;  %v493_v19 = vmov 0.0  }
   0x6   :  { %431 = vmatpush.msra.mxu2 %v18_v4  ;;  %89 = vmatpush.msra.mxu1 %v18_v4  ;;  %v16_v6 = vld [vmem:[%s617_s1 + $0x20] sm:$0xff]  ;;  %v15_v7 = vld [vmem:[%s617_s1 + $0x18] sm:$0xff]  ;;  %v22_v9 = vld [vmem:[%s617_s1 + $0x50] sm:$0xff]  ;;  %vm323_vm2 = vcmask 1041408   ;;  %vm325_vm3 = vcmask 1043456   ;;  %vm327_vm4 = vcmask 1045504  }
   0x7   :  { %v23_v8 = vld [vmem:[%s617_s1 + $0x58] sm:$0xff]  ;;  %v21_v10 = vld [vmem:[%s617_s1 + $0x48] sm:$0xff]  ;;  %v20_v11 = vld [vmem:[%s617_s1 + $0x40] sm:$0xff]  ;;  %s402_s30 = sshll.u32 %s618_s2, 4  ;;  %s495_s3 = smov 128   ;;  %s403_s30 = int_to_ptr.hbm [resolvable:$true] %s402_s30 }
   0x8   :  { %432 = vmatpush.msra.mxu2 %v17_v5  ;;  %90 = vmatpush.msra.mxu1 %v17_v5  ;;  %v439_v12 = vld [vmem:[%s617_s1 + $0x10] ss:$0 sm:$0xff]  ;;  %v440_v20 = vld [vmem:[%s617_s1 + $0x38] ss:$0 sm:$0xff]  ;;  %v25_v42 = vld [vmem:[%s617_s1 + $0x68] sm:$0xff]  ;;  %s496_s4 = smov 8  }
   0x9   :  { %140 = vmatpush.msrb.mxu3 %v23_v8  ;;  %227 = vmatpush.msrb.mxu0 %v23_v8  ;;  %v27_v40 = vld [vmem:[%s617_s1 + $0x78] sm:$0xff]  ;;  %v26_v41 = vld [vmem:[%s617_s1 + $0x70] sm:$0xff]  ;;  %v24_v43 = vld [vmem:[%s617_s1 + $0x60] sm:$0xff] }
   0xa   :  { %433 = vmatpush.msra.mxu2 %v16_v6  ;;  %91 = vmatpush.msra.mxu1 %v16_v6  ;;  %v32_v50 = vld [vmem:[%s617_s1 + $0xa0] sm:$0xff]  ;;  %v31_v51 = vld [vmem:[%s617_s1 + $0x98] sm:$0xff]  ;;  %v30_v52 = vld [vmem:[%s617_s1 + $0x90] sm:$0xff] }
   0xb   :  { %141 = vmatpush.msrb.mxu3 %v22_v9  ;;  %228 = vmatpush.msrb.mxu0 %v22_v9  ;;  %v29_v53 = vld [vmem:[%s617_s1 + $0x88] sm:$0xff]  ;;  %v441_v56 = vld [vmem:[%s617_s1 + $0x80] ss:$0 sm:$0xff] }
   0xc   :  { %434 = vmatpush.msra.mxu2 %v15_v7  ;;  %92 = vmatpush.msra.mxu1 %v15_v7  ;;  %v442_v0 = vld [vmem:[%s617_s1 + $0xa8] ss:$0 sm:$0xff]  ;;  %s494_s1 = smov [#allocation2]  }
   0xd   :  { %142 = vmatpush.msrb.mxu3 %v21_v10  ;;  %229 = vmatpush.msrb.mxu0 %v21_v10  ;;  %s400_s27 = sshll.u32 %s494_s1, 4  ;;  %s401_s27 = int_to_ptr.vmem [resolvable:$true] %s400_s27 }
   0xe   :  { %115 = vmatpush.msrb.mxu2 %v23_v8  ;;  %252 = vmatpush.msrb.mxu1 %v23_v8 }
   0xf   :  { %143 = vmatpush.msrb.mxu3 %v20_v11  ;;  %230 = vmatpush.msrb.mxu0 %v20_v11 }
  0x10   :  { %116 = vmatpush.msrb.mxu2 %v22_v9  ;;  %253 = vmatpush.msrb.mxu1 %v22_v9 }
  0x11   :  { %198 = vmatpush.msra.mxu3 %v23_v8  ;;  %351 = vmatpush.msra.mxu0 %v27_v40 }
  0x12   :  { %117 = vmatpush.msrb.mxu2 %v21_v10  ;;  %254 = vmatpush.msrb.mxu1 %v21_v10 }
  0x13   :  { %199 = vmatpush.msra.mxu3 %v22_v9  ;;  %352 = vmatpush.msra.mxu0 %v26_v41 }
  0x14   :  { %118 = vmatpush.msrb.mxu2 %v20_v11  ;;  %255 = vmatpush.msrb.mxu1 %v20_v11 }
  0x15   :  { %200 = vmatpush.msra.mxu3 %v21_v10  ;;  %353 = vmatpush.msra.mxu0 %v25_v42 }
  0x17   :  { %201 = vmatpush.msra.mxu3 %v20_v11  ;;  %354 = vmatpush.msra.mxu0 %v24_v43 }
  0x82   :  { %v61_v13 = vpop.f32.mrf.mxu0 }
  0x83   :  { %v62_v14 = vadd.f32 %v439_v12, %v61_v13 }
  0x85   :  { %443 = vtanh.f32 %v62_v14 }
  0x88   :  { %v64_v15 = vpop.f32.mrf.mxu3 }
  0x89   :  { %v65_v16 = vadd.f32 %v439_v12, %v64_v15 }
  0x8b   :  { %v444_v17 = vpop.eup %443  ;;  %445 = vtanh.f32 %v65_v16 }
  0x8c   :  { %416 = vmatmul.msk.f32.vlgmr.msra.gmra.mxu1 %vm70_vm1, %v444_v17 }
  0x8d   :  { %383 = vmatpush.msra.mxu1 %v32_v50 }
  0x8f   :  { %384 = vmatpush.msra.mxu1 %v31_v51 }
  0x91   :  { %v446_v18 = vpop.eup %445  ;;  %385 = vmatpush.msra.mxu1 %v30_v52 }
  0x92   :  { %417 = vmatmul.msk.f32.vlgmr.msra.gmra.mxu2 %vm70_vm1, %v446_v18 }
  0x93   :  { %169 = vmatpush.msra.mxu2 %v23_v8  ;;  %386 = vmatpush.msra.mxu1 %v29_v53 }
  0x95   :  { %170 = vmatpush.msra.mxu2 %v22_v9 }
  0x97   :  { %171 = vmatpush.msra.mxu2 %v21_v10 }
  0x99   :  { %172 = vmatpush.msra.mxu2 %v20_v11 }
  0x9a   :  { %119 = vmatmul.f32.vlgmr.msrb.gmra.mxu2 %v493_v19 }
  0x9b   :  { %281 = vmatpush.msrb.mxu2 %v23_v8 }
  0x9d   :  { %282 = vmatpush.msrb.mxu2 %v22_v9 }
  0x9f   :  { %283 = vmatpush.msrb.mxu2 %v21_v10 }
  0xa1   :  { %284 = vmatpush.msrb.mxu2 %v20_v11 }
 0x109   :  { %v94_v23 = vpop.f32.mrf.mxu1 }
 0x10a   :  { %v95_v24 = vadd.f32 %v440_v20, %v94_v23 }
 0x115   :  { %v97_v21 = vpop.f32.mrf.mxu2 }
 0x116   :  { %v558_v22 = vadd.f32 %v440_v20, %v97_v21 }
 0x11d   :  { %v120_v25 = vpop.f32.mrf.mxu2 }
 0x11e   :  { %v123_v26 = vadd.f32 %v120_v25, %v95_v24 }
 0x120   :  { %447 = vtanh.f32 %v123_v26 }
 0x126   :  { %v448_v27 = vpop.eup %447 }
 0x127   :  { %418 = vmatmul.msk.f32.vlgmr.msrb.gmra.mxu3 %vm70_vm1, %v448_v27 }
 0x128   :  { %310 = vmatpush.msrb.mxu3 %v23_v8 }
 0x12a   :  { %311 = vmatpush.msrb.mxu3 %v22_v9 }
 0x12c   :  { %312 = vmatpush.msrb.mxu3 %v21_v10 }
 0x12e   :  { %313 = vmatpush.msrb.mxu3 %v20_v11 }
 0x1aa   :  { %v145_v28 = vpop.f32.mrf.mxu3 }
 0x1ab   :  { %v149_v29 = vrot.slane %v145_v28, 6 }
 0x1ad   :  { %v151_v30 = vadd.f32 %v149_v29, %v95_v24 }
 0x1af   :  { %449 = vtanh.f32 %v151_v30 }
 0x1b5   :  { %v450_v31 = vpop.eup %449 }
 0x1b6   :  { %v154_v32 = vrot.slane %v450_v31, 2  ;;  %v324_v37 = vsel %vm323_vm2, %v448_v27, %v450_v31 }
 0x1b8   :  { %419 = vmatmul.msk.f32.vlgmr.msra.gmra.mxu2 %vm70_vm1, %v154_v32 }
 0x23b   :  { %v174_v33 = vpop.f32.mrf.mxu2 }
 0x23c   :  { %v178_v34 = vrot.slane %v174_v33, 4 }
 0x23e   :  { %v180_v35 = vadd.f32 %v178_v34, %v95_v24 }
 0x240   :  { %451 = vtanh.f32 %v180_v35 }
 0x246   :  { %v452_v36 = vpop.eup %451 }
 0x247   :  { %v183_v38 = vrot.slane %v452_v36, 4  ;;  %v326_v39 = vsel %vm325_vm3, %v324_v37, %v452_v36 }
 0x249   :  { %420 = vmatmul.msk.f32.vlgmr.msra.gmra.mxu3 %vm70_vm1, %v183_v38 }
 0x2cc   :  { %v203_v44 = vpop.f32.mrf.mxu3 }
 0x2cd   :  { %v207_v45 = vrot.slane %v203_v44, 2 }
 0x2cf   :  { %v209_v46 = vadd.f32 %v207_v45, %v95_v24 }
 0x2d1   :  { %453 = vtanh.f32 %v209_v46 }
 0x2d7   :  { %v454_v47 = vpop.eup %453 }
 0x2d8   :  { %v212_v48 = vrot.slane %v454_v47, 6  ;;  %v328_v49 = vsel %vm327_vm4, %v326_v39, %v454_v47 }
 0x2da   :  { %421 = vmatmul.msk.f32.vlgmr.msrb.gmra.mxu0 %vm70_vm1, %v212_v48 }
 0x2e2   :  { %425 = vmatmul.msk.f32.vlgmr.msra.gmra.mxu0 %vm70_vm1, %v328_v49 }
 0x357   :  { %v232_v54 = vpop.f32.mrf.mxu0 }
 0x358   :  { %v235_v55 = vadd.f32 %v232_v54, %v558_v22 }
 0x35a   :  { %455 = vtanh.f32 %v235_v55 }
 0x35f   :  { %v356_v57 = vpop.f32.mrf.mxu0 }
 0x360   :  { %v456_v58 = vpop.eup %455  ;;  %v357_v59 = vadd.f32 %v441_v56, %v356_v57 }
 0x361   :  { %422 = vmatmul.msk.f32.vlgmr.msrb.gmra.mxu1 %vm70_vm1, %v456_v58 }
 0x362   :  { %457 = vtanh.f32 %v357_v59 }
 0x368   :  { %v458_v60 = vpop.eup %457 }
 0x369   :  { %427 = vmatmul.msk.f32.vlgmr.msra.gmra.mxu1 %vm70_vm1, %v458_v60 }
 0x3de   :  { %v257_v61 = vpop.f32.mrf.mxu1 }
 0x3df   :  { %v261_v62 = vrot.slane %v257_v61, 6 }
 0x3e1   :  { %v263_v63 = vadd.f32 %v261_v62, %v558_v22 }
 0x3e3   :  { %459 = vtanh.f32 %v263_v63 }
 0x3e6   :  { %v388_v1 = vpop.f32.mrf.mxu1 }
 0x3e7   :  { %v389_v2 = vadd.f32 %v442_v0, %v388_v1 }
 0x3e9   :  { %v460_v3 = vpop.eup %459  ;;  %394 = vst.msk [vmem:[#allocation2] sm:$0xff] %vm37_vm0, %v389_v2 }
 0x3ea   :  { %v266_v4 = vrot.slane %v460_v3, 2  ;;  %v329_v9 = vsel %vm323_vm2, %v456_v58, %v460_v3 }
 0x3ec   :  { %423 = vmatmul.msk.f32.vlgmr.msrb.gmra.mxu2 %vm70_vm1, %v266_v4 }
 0x46f   :  { %v286_v5 = vpop.f32.mrf.mxu2 }
 0x470   :  { %v290_v6 = vrot.slane %v286_v5, 4 }
 0x472   :  { %v292_v7 = vadd.f32 %v290_v6, %v558_v22 }
 0x474   :  { %461 = vtanh.f32 %v292_v7 }
 0x47a   :  { %v462_v8 = vpop.eup %461 }
 0x47b   :  { %v295_v10 = vrot.slane %v462_v8, 4  ;;  %v330_v11 = vsel %vm325_vm3, %v329_v9, %v462_v8 }
 0x47d   :  { %424 = vmatmul.msk.f32.vlgmr.msrb.gmra.mxu3 %vm70_vm1, %v295_v10 }
 0x500   :  { %v315_v12 = vpop.f32.mrf.mxu3 }
 0x501   :  { %v319_v13 = vrot.slane %v315_v12, 2 }
 0x503   :  { %v321_v14 = vadd.f32 %v319_v13, %v558_v22 }
 0x505   :  { %463 = vtanh.f32 %v321_v14 }
 0x50b   :  { %v464_v15 = vpop.eup %463 }
 0x50c   :  { %v331_v16 = vsel %vm327_vm4, %v330_v11, %v464_v15 }
 0x50d   :  { %426 = vmatmul.msk.f32.gmra.mxu0 %vm70_vm1, %v331_v16 }
 0x58a   :  { %v359_v17 = vpop.f32.mrf.mxu0 }
 0x58b   :  { %v360_v18 = vadd.f32 %v441_v56, %v359_v17 }
 0x58d   :  { %465 = vtanh.f32 %v360_v18 }
 0x593   :  { %v466_v19 = vpop.eup %465 }
 0x594   :  { %428 = vmatmul.msk.f32.gmra.mxu1 %vm70_vm1, %v466_v19 }
 0x611   :  { %v391_v20 = vpop.f32.mrf.mxu1 }
 0x612   :  { %v392_v21 = vadd.f32 %v442_v0, %v391_v20 }
 0x614   :  { %395 = vst.msk [vmem:[#allocation2 + $0x8] sm:$0xff] %vm37_vm0, %v392_v21 }
 0x615   :  { %408 = dma.vmem_to_hbm [thread:$0]  %s401_s27, 256, %s403_s30, [#allocation3], %s495_s3, %s495_s3, %s496_s4  }
 0x616   :  { %491 = dma.done.wait [#allocation3], 256  }
 0x617   :  { %492 = vsyncadd [#allocation3], 4294967040 }
 0x618   :  { %413 = vsyncpa [#allocation3], 1 }

</bundles_post_ra>
